<compile_context>
chip_gen: v7x
topology: tpu7x:2x2x1
jax: 0.10.0
libtpu: 0.0.40
codegen_flags: <defaults>
</compile_context>

<pallas_src>
import functools

import jax
import jax.numpy as jnp
from jax.experimental import pallas as pl
from jax.experimental.pallas import tpu as pltpu

DATASETS_CLASSES = {'mnist': 10, 'cifar10': 10, 'cifar100': 100,
                    'cub': 200, 'aircraft': 100, 'cars': 196}

EPS = 1e-15        # norm clamp (matches geoopt min_norm)
ATANH_EPS = 1e-7   # artanh input clamp

# f32 elements per x VMEM buffer (~8 MiB); double-buffered -> <= 16 MiB of x
# in VMEM, leaving ample headroom even on v7x (64 MiB physical).
_X_TILE_BUDGET_ELEMS = 2 * 1024 * 1024
_FALLBACK_TK = 1024           # K tile for the (rare) huge-Din fallback path


def _cdiv(a, b):
    return -(-a // b)


def _round_up(v, m):
    return _cdiv(v, m) * m


def _vmem_limit(needed_bytes):
    return int(min(max(needed_bytes + (8 << 20), 32 << 20), 64 << 20))


def _expmap0_host(v):
    """Host-side expmap0 (c=1) used only for deterministic prototype init."""
    n = jnp.maximum(jnp.linalg.norm(v, axis=-1, keepdims=True), EPS)
    return jnp.tanh(n) * v / n


def _pick_batch_tiling(bsz, row_elems):
    """Pick (tm, num_tiles) for the batch axis.

    * x f32 tile (tm x row_elems) stays under the VMEM budget,
    * >= 2 tiles whenever bsz >= 16 so v7x megacore splits the batch axis,
    * tm minimizes padding; a single tile uses the full extent (no padding).
    """
    tm_vmem = max(8, (_X_TILE_BUDGET_ELEMS // max(row_elems, 1)) // 8 * 8)
    tm_cap = min(512, tm_vmem)
    nt = _cdiv(bsz, tm_cap)
    if bsz >= 16:
        nt = max(nt, 2)
    tm = _round_up(_cdiv(bsz, nt), 8)
    if tm >= bsz:
        return bsz, 1                       # full-extent block, no batch pad
    nt = _cdiv(bsz, tm)
    return tm, nt


# ----------------------------------------------------------------------------
# Kernel bodies
# ----------------------------------------------------------------------------
def _hyperbolic_head(emb, pt, y2, *, clipping, inv_temp):
    """clip -> expmap0 -> Poincare distance to every prototype -> -dist / T."""
    # Single cross-lane reduction: ||emb||.
    n = jnp.sqrt(jnp.sum(emb * emb, axis=-1, keepdims=True))        # (tm, 1)

    # clip(emb, r) then expmap0, fused into one per-row scale.  After clipping
    # ||emb_clipped|| = max(min(n, r), EPS) =: vn, so xh = tanh(vn)*emb_c/vn
    # and ||xh||^2 = tanh(vn)^2 (no second cross-lane reduction needed).
    clip_s = jnp.minimum(1.0, clipping / jnp.maximum(n, EPS))        # (tm, 1)
    vn = jnp.maximum(jnp.minimum(n, clipping), EPS)                  # (tm, 1)
    t = jnp.tanh(vn)                                                 # (tm, 1)
    xh = emb * (t * clip_s / vn)                                     # (tm, D)
    x2 = t * t                                                       # (tm, 1)

    # Hyperbolic distance to all prototypes via one matmul:
    #   u = -x, A = 1 + 2<u,p> + ||p||^2, Bc = 1 - ||u||^2
    #   ||num||^2 = A^2||u||^2 + 2 A Bc <u,p> + Bc^2 ||p||^2
    #   den       = 1 + 2<u,p> + ||u||^2 ||p||^2
    xy = jnp.dot(xh, pt, preferred_element_type=jnp.float32)         # (tm, NCp)
    uv = -xy
    a = 1.0 + 2.0 * uv + y2
    bc = 1.0 - x2
    num2 = a * a * x2 + 2.0 * a * bc * uv + bc * bc * y2
    den = 1.0 + 2.0 * uv + x2 * y2
    z = jnp.sqrt(jnp.maximum(num2, 0.0)) * pl.reciprocal(den, approx=True)
    z = jnp.clip(z, 0.0, 1.0 - ATANH_EPS)
    # dist = 2*artanh(z) = log((1+z)/(1-z)); exact divide (epilogue is cheap
    # and 1/T = 100 amplifies error near the z -> 1 clamp).
    dist = jnp.log((1.0 + z) / (1.0 - z))
    return dist * inv_temp                                           # -dist / T


def _hbl_kernel_single(x_ref, w_ref, b_ref, pt_ref, y2_ref, out_ref,
                       *, clipping, inv_temp):
    """Single-pass kernel: whole Din resident; grid = (batch tiles,)."""
    x = x_ref[...].astype(jnp.bfloat16)                 # in-kernel bf16 cast
    emb = jnp.dot(x, w_ref[...],
                  preferred_element_type=jnp.float32) + b_ref[...]
    out_ref[...] = _hyperbolic_head(
        emb, pt_ref[...], y2_ref[...],
        clipping=clipping, inv_temp=inv_temp).astype(out_ref.dtype)


def _hbl_kernel_ktiled(x_ref, w_ref, b_ref, pt_ref, y2_ref, out_ref, acc_ref,
                       *, tk, clipping, inv_temp):
    """Fallback for very large Din: K-tiled reduction, resident W block."""
    k = pl.program_id(1)

    @pl.when(k == 0)
    def _():
        acc_ref[...] = jnp.broadcast_to(b_ref[...], acc_ref.shape)

    w_tile = w_ref[pl.ds(pl.multiple_of(k * tk, 128), tk), :]
    acc_ref[...] += jnp.dot(x_ref[...].astype(jnp.bfloat16), w_tile,
                            preferred_element_type=jnp.float32)

    @pl.when(k == pl.num_programs(1) - 1)
    def _():
        out_ref[...] = _hyperbolic_head(
            acc_ref[...], pt_ref[...], y2_ref[...],
            clipping=clipping, inv_temp=inv_temp).astype(out_ref.dtype)


# ----------------------------------------------------------------------------
# Wrapper
# ----------------------------------------------------------------------------
def prepare_hbl_params(w, b, prototypes):
    """Batch-independent parameter prep (hoisted out of the per-call path)."""
    din, d = w.shape
    nc = prototypes.shape[0]
    nc_pad = _round_up(nc, 128)                 # lane-dense output / prototypes

    single_pass = din * 8 <= _X_TILE_BUDGET_ELEMS
    din_pad = din if single_pass else _round_up(din, _FALLBACK_TK)

    w_bf16 = w.astype(jnp.bfloat16)             # bf16 backbone weights (MXU)
    if din_pad != din:
        w_bf16 = jnp.zeros((din_pad, d), jnp.bfloat16).at[:din, :].set(w_bf16)

    b2 = jnp.reshape(b, (1, d)).astype(jnp.float32)

    pt = jnp.zeros((d, nc_pad), jnp.float32)
    pt = pt.at[:, :nc].set(prototypes.T.astype(jnp.float32))
    y2 = jnp.sum(pt * pt, axis=0, keepdims=True)          # hoisted ||p||^2

    return dict(w=w_bf16, b=b2, pt=pt, y2=y2,
                din=din, din_pad=din_pad, d=d, nc=nc, nc_pad=nc_pad,
                single_pass=single_pass)


def hbl_forward(images, params, *, clipping=1.0, temperature=0.01):
    bsz = images.shape[0]
    x = images.reshape(bsz, -1).astype(jnp.float32)   # NCHW flatten (= .view(B,-1))
    din, d = params['din'], params['d']
    nc, nc_pad = params['nc'], params['nc_pad']
    assert x.shape[1] == din
    clip_r = float(clipping)
    inv_temp = -1.0 / float(temperature)

    if params['single_pass']:
        tm, nt = _pick_batch_tiling(bsz, din)
        b_pad = tm * nt
        if b_pad != bsz:                                  # rare; <= 7*nt rows
            x = jnp.zeros((b_pad, din), jnp.float32).at[:bsz, :].set(x)

        kernel = functools.partial(_hbl_kernel_single,
                                   clipping=clip_r, inv_temp=inv_temp)
        vmem_needed = 2 * (tm * din * 4 + din * d * 2 + d * nc_pad * 4
                           + (nc_pad + d) * 4 + tm * nc_pad * 4)
        cost = pl.CostEstimate(
            flops=2 * b_pad * din * d + 2 * b_pad * d * nc_pad,
            transcendentals=b_pad * (1 + nc_pad),
            bytes_accessed=(b_pad * din * 4 + din * d * 2 + d * nc_pad * 4
                            + b_pad * nc_pad * 4))

        out = pl.pallas_call(
            kernel,
            out_shape=jax.ShapeDtypeStruct((b_pad, nc_pad), jnp.float32),
            grid_spec=pltpu.PrefetchScalarGridSpec(
                num_scalar_prefetch=0,
                grid=(nt,),
                in_specs=[
                    pl.BlockSpec((tm, din), lambda i: (i, 0)),     # x (f32)
                    pl.BlockSpec((din, d), lambda i: (0, 0)),      # W (bf16, resident)
                    pl.BlockSpec((1, d), lambda i: (0, 0)),        # bias
                    pl.BlockSpec((d, nc_pad), lambda i: (0, 0)),   # prototypes^T
                    pl.BlockSpec((1, nc_pad), lambda i: (0, 0)),   # ||p||^2
                ],
                out_specs=pl.BlockSpec((tm, nc_pad), lambda i: (i, 0)),
            ),
            compiler_params=pltpu.CompilerParams(
                dimension_semantics=("parallel",),
                vmem_limit_bytes=_vmem_limit(vmem_needed)),
            cost_estimate=cost,
        )(x, params['w'], params['b'], params['pt'], params['y2'])

    else:
        # Huge-Din fallback: K-tiled reduction with an f32 VMEM accumulator.
        din_pad = params['din_pad']
        tk = _FALLBACK_TK
        tm, nt = _pick_batch_tiling(bsz, tk)
        b_pad = tm * nt
        x_p = jnp.zeros((b_pad, din_pad), jnp.float32).at[:bsz, :din].set(x)

        kernel = functools.partial(_hbl_kernel_ktiled, tk=tk,
                                   clipping=clip_r, inv_temp=inv_temp)
        vmem_needed = (2 * (tm * tk * 4 + tm * nc_pad * 4)
                       + 2 * (din_pad * d * 2 + d * nc_pad * 4 + (nc_pad + d) * 4)
                       + tm * d * 4)
        cost = pl.CostEstimate(
            flops=2 * b_pad * din_pad * d + 2 * b_pad * d * nc_pad,
            transcendentals=b_pad * (1 + nc_pad),
            bytes_accessed=(b_pad * din_pad * 4 + din_pad * d * 2
                            + d * nc_pad * 4 + b_pad * nc_pad * 4))

        out = pl.pallas_call(
            kernel,
            out_shape=jax.ShapeDtypeStruct((b_pad, nc_pad), jnp.float32),
            grid_spec=pltpu.PrefetchScalarGridSpec(
                num_scalar_prefetch=0,
                grid=(nt, din_pad // tk),
                in_specs=[
                    pl.BlockSpec((tm, tk), lambda i, k: (i, k)),        # x tile
                    pl.BlockSpec((din_pad, d), lambda i, k: (0, 0)),    # W resident
                    pl.BlockSpec((1, d), lambda i, k: (0, 0)),          # bias
                    pl.BlockSpec((d, nc_pad), lambda i, k: (0, 0)),     # prototypes^T
                    pl.BlockSpec((1, nc_pad), lambda i, k: (0, 0)),     # ||p||^2
                ],
                out_specs=pl.BlockSpec((tm, nc_pad), lambda i, k: (i, 0)),
                scratch_shapes=[pltpu.VMEM((tm, d), jnp.float32)],
            ),
            compiler_params=pltpu.CompilerParams(
                dimension_semantics=("parallel", "arbitrary"),
                vmem_limit_bytes=_vmem_limit(vmem_needed)),
            cost_estimate=cost,
        )(x_p, params['w'], params['b'], params['pt'], params['y2'])

    return out[:bsz, :nc]


if __name__ == "__main__":
    key = jax.random.PRNGKey(0)
    k_img, k_w, k_proto = jax.random.split(key, 3)

    # Small shapes consistent with the forward pass.
    B, C, H, W = 2, 4, 16, 16
    output_dim = 8
    dataset = 'mnist'
    num_classes = DATASETS_CLASSES[dataset]
    clipping = 1.0
    temperature = 0.01

    images = jax.random.normal(k_img, (B, C, H, W), jnp.float32)

    # Deterministic parameter init (backbone linear + hyperbolic prototypes).
    # TODO(synk): the reference backbone `self.model` is unspecified; modeled
    # as a single linear layer here.
    din = C * H * W
    w = 0.02 * jax.random.normal(k_w, (din, output_dim), jnp.float32)
    b = jnp.zeros((output_dim,), jnp.float32)
    # prototypes = expmap0(-0.1 * rand(NC, D) + 0.1), as in __init__
    proto_pre = -0.1 * jax.random.uniform(k_proto, (num_classes, output_dim),
                                          jnp.float32) + 0.1
    prototypes = _expmap0_host(proto_pre)

    params = prepare_hbl_params(w, b, prototypes)   # once, not per forward
    out = hbl_forward(images, params,
                      clipping=clipping, temperature=temperature)
    jax.block_until_ready(out)
    assert out.shape == (B, num_classes) and bool(jnp.all(jnp.isfinite(out)))
    print("KERNEL_OK")
</pallas_src>

<mosaic_0001>
module attributes {stable_mosaic.version = 11 : i64} {
  func.func @_hbl_kernel_single(%arg0: i32, %arg1: memref<2x1024xf32, #tpu.memory_space<vmem>>, %arg2: memref<1024x8xbf16, #tpu.memory_space<vmem>>, %arg3: memref<1x8xf32, #tpu.memory_space<vmem>>, %arg4: memref<8x128xf32, #tpu.memory_space<vmem>>, %arg5: memref<1x128xf32, #tpu.memory_space<vmem>>, %arg6: memref<2x128xf32, #tpu.memory_space<vmem>>) attributes {dimension_semantics = [#tpu.dimension_semantics<parallel>], iteration_bounds = array<i64: 1>, scalar_prefetch = 0 : i64, scratch_operands = 0 : i64, tpu.core_type = #tpu.core_type<tc>, window_params = [{transform_indices = @transform_0, window_bounds = array<i64: 2, 1024>}, {pipeline_mode = #tpu.pipeline_mode<synchronous>, transform_indices = @transform_1, window_bounds = array<i64: 1024, 8>}, {pipeline_mode = #tpu.pipeline_mode<synchronous>, transform_indices = @transform_2, window_bounds = array<i64: 1, 8>}, {pipeline_mode = #tpu.pipeline_mode<synchronous>, transform_indices = @transform_3, window_bounds = array<i64: 8, 128>}, {pipeline_mode = #tpu.pipeline_mode<synchronous>, transform_indices = @transform_4, window_bounds = array<i64: 1, 128>}, {transform_indices = @transform_5, window_bounds = array<i64: 2, 128>}]} {
    %c0 = arith.constant 0 : index
    %c0_0 = arith.constant 0 : index
    %0 = vector.load %arg1[%c0, %c0_0] : memref<2x1024xf32, #tpu.memory_space<vmem>>, vector<2x1024xf32>
    %1 = arith.truncf %0 : vector<2x1024xf32> to vector<2x1024xbf16>
    %c0_1 = arith.constant 0 : index
    %c0_2 = arith.constant 0 : index
    %2 = vector.load %arg2[%c0_1, %c0_2] : memref<1024x8xbf16, #tpu.memory_space<vmem>>, vector<1024x8xbf16>
    %cst = arith.constant dense<0.000000e+00> : vector<2x8xf32>
    %3 = tpu.matmul %1, %2, %cst {dimension_numbers = #tpu.dot_dimension_numbers<[1], [0], [0], [1], [0, 0, 1, 1], [], []>} : vector<2x1024xbf16>, vector<1024x8xbf16>, vector<2x8xf32> -> vector<2x8xf32>
    %c0_3 = arith.constant 0 : index
    %c0_4 = arith.constant 0 : index
    %4 = vector.load %arg3[%c0_3, %c0_4] : memref<1x8xf32, #tpu.memory_space<vmem>>, vector<1x8xf32>
    %5 = vector.broadcast %4 : vector<1x8xf32> to vector<2x8xf32>
    %6 = arith.addf %3, %5 : vector<2x8xf32>
    %c0_5 = arith.constant 0 : index
    %c0_6 = arith.constant 0 : index
    %7 = vector.load %arg4[%c0_5, %c0_6] : memref<8x128xf32, #tpu.memory_space<vmem>>, vector<8x128xf32>
    %c0_7 = arith.constant 0 : index
    %c0_8 = arith.constant 0 : index
    %8 = vector.load %arg5[%c0_7, %c0_8] : memref<1x128xf32, #tpu.memory_space<vmem>>, vector<1x128xf32>
    %9 = arith.mulf %6, %6 : vector<2x8xf32>
    %cst_9 = arith.constant dense<0.000000e+00> : vector<2xf32>
    %10 = vector.multi_reduction <add>, %9, %cst_9 [1] : vector<2x8xf32> to vector<2xf32>
    %11 = vector.shape_cast %10 : vector<2xf32> to vector<2x1xf32>
    %12 = math.sqrt %11 : vector<2x1xf32>
    %cst_10 = arith.constant 1.000000e-15 : f32
    %13 = vector.broadcast %cst_10 : f32 to vector<2x1xf32>
    %14 = arith.maximumf %12, %13 : vector<2x1xf32>
    %cst_11 = arith.constant 1.000000e+00 : f32
    %15 = vector.broadcast %cst_11 : f32 to vector<2x1xf32>
    %16 = arith.divf %15, %14 : vector<2x1xf32>
    %cst_12 = arith.constant 1.000000e+00 : f32
    %17 = vector.broadcast %cst_12 : f32 to vector<2x1xf32>
    %18 = arith.minimumf %17, %16 : vector<2x1xf32>
    %cst_13 = arith.constant 1.000000e+00 : f32
    %19 = vector.broadcast %cst_13 : f32 to vector<2x1xf32>
    %20 = arith.minimumf %12, %19 : vector<2x1xf32>
    %cst_14 = arith.constant 1.000000e-15 : f32
    %21 = vector.broadcast %cst_14 : f32 to vector<2x1xf32>
    %22 = arith.maximumf %20, %21 : vector<2x1xf32>
    %23 = math.tanh %22 : vector<2x1xf32>
    %24 = arith.mulf %23, %18 : vector<2x1xf32>
    %25 = arith.divf %24, %22 : vector<2x1xf32>
    %26 = vector.broadcast %25 : vector<2x1xf32> to vector<2x8xf32>
    %27 = arith.mulf %6, %26 : vector<2x8xf32>
    %28 = arith.mulf %23, %23 : vector<2x1xf32>
    %cst_15 = arith.constant dense<0.000000e+00> : vector<2x128xf32>
    %29 = tpu.matmul %27, %7, %cst_15 {dimension_numbers = #tpu.dot_dimension_numbers<[1], [0], [0], [1], [0, 0, 1, 1], [], []>} : vector<2x8xf32>, vector<8x128xf32>, vector<2x128xf32> -> vector<2x128xf32>
    %cst_16 = arith.constant 0.000000e+00 : f32
    %30 = vector.broadcast %cst_16 : f32 to vector<2x128xf32>
    %31 = arith.subf %30, %29 : vector<2x128xf32>
    %cst_17 = arith.constant 2.000000e+00 : f32
    %32 = vector.broadcast %cst_17 : f32 to vector<2x128xf32>
    %33 = arith.mulf %32, %31 : vector<2x128xf32>
    %cst_18 = arith.constant 1.000000e+00 : f32
    %34 = vector.broadcast %cst_18 : f32 to vector<2x128xf32>
    %35 = arith.addf %34, %33 : vector<2x128xf32>
    %36 = vector.broadcast %8 : vector<1x128xf32> to vector<2x128xf32>
    %37 = arith.addf %35, %36 : vector<2x128xf32>
    %cst_19 = arith.constant 1.000000e+00 : f32
    %38 = vector.broadcast %cst_19 : f32 to vector<2x1xf32>
    %39 = arith.subf %38, %28 : vector<2x1xf32>
    %40 = arith.mulf %37, %37 : vector<2x128xf32>
    %41 = vector.broadcast %28 : vector<2x1xf32> to vector<2x128xf32>
    %42 = arith.mulf %40, %41 : vector<2x128xf32>
    %cst_20 = arith.constant 2.000000e+00 : f32
    %43 = vector.broadcast %cst_20 : f32 to vector<2x128xf32>
    %44 = arith.mulf %43, %37 : vector<2x128xf32>
    %45 = vector.broadcast %39 : vector<2x1xf32> to vector<2x128xf32>
    %46 = arith.mulf %44, %45 : vector<2x128xf32>
    %47 = arith.mulf %46, %31 : vector<2x128xf32>
    %48 = arith.addf %42, %47 : vector<2x128xf32>
    %49 = arith.mulf %39, %39 : vector<2x1xf32>
    %50 = vector.broadcast %49 : vector<2x1xf32> to vector<2x128xf32>
    %51 = vector.broadcast %8 : vector<1x128xf32> to vector<2x128xf32>
    %52 = arith.mulf %50, %51 : vector<2x128xf32>
    %53 = arith.addf %48, %52 : vector<2x128xf32>
    %cst_21 = arith.constant 2.000000e+00 : f32
    %54 = vector.broadcast %cst_21 : f32 to vector<2x128xf32>
    %55 = arith.mulf %54, %31 : vector<2x128xf32>
    %cst_22 = arith.constant 1.000000e+00 : f32
    %56 = vector.broadcast %cst_22 : f32 to vector<2x128xf32>
    %57 = arith.addf %56, %55 : vector<2x128xf32>
    %58 = vector.broadcast %28 : vector<2x1xf32> to vector<2x128xf32>
    %59 = vector.broadcast %8 : vector<1x128xf32> to vector<2x128xf32>
    %60 = arith.mulf %58, %59 : vector<2x128xf32>
    %61 = arith.addf %57, %60 : vector<2x128xf32>
    %cst_23 = arith.constant 0.000000e+00 : f32
    %62 = vector.broadcast %cst_23 : f32 to vector<2x128xf32>
    %63 = arith.maximumf %53, %62 : vector<2x128xf32>
    %64 = math.sqrt %63 : vector<2x128xf32>
    %65 = tpu.reciprocal %61 {approx = true} : vector<2x128xf32> -> vector<2x128xf32>
    %66 = arith.mulf %64, %65 : vector<2x128xf32>
    %cst_24 = arith.constant 0.000000e+00 : f32
    %cst_25 = arith.constant 0.99999988 : f32
    %67 = vector.broadcast %cst_24 : f32 to vector<2x128xf32>
    %68 = arith.maximumf %67, %66 : vector<2x128xf32>
    %69 = vector.broadcast %cst_25 : f32 to vector<2x128xf32>
    %70 = arith.minimumf %69, %68 : vector<2x128xf32>
    %cst_26 = arith.constant 1.000000e+00 : f32
    %71 = vector.broadcast %cst_26 : f32 to vector<2x128xf32>
    %72 = arith.addf %71, %70 : vector<2x128xf32>
    %cst_27 = arith.constant 1.000000e+00 : f32
    %73 = vector.broadcast %cst_27 : f32 to vector<2x128xf32>
    %74 = arith.subf %73, %70 : vector<2x128xf32>
    %75 = arith.divf %72, %74 : vector<2x128xf32>
    %76 = math.log %75 : vector<2x128xf32>
    %cst_28 = arith.constant -1.000000e+02 : f32
    %77 = vector.broadcast %cst_28 : f32 to vector<2x128xf32>
    %78 = arith.mulf %76, %77 : vector<2x128xf32>
    %c0_29 = arith.constant 0 : index
    %c0_30 = arith.constant 0 : index
    %79 = vector.load %arg6[%c0_29, %c0_30] : memref<2x128xf32, #tpu.memory_space<vmem>>, vector<2x128xf32>
    tpu.vector_store %arg6[%c0_29, %c0_30], %78 {strides = array<i32>} : memref<2x128xf32, #tpu.memory_space<vmem>>, vector<2x128xf32>,
    return
  }
  func.func @transform_0(%arg0: i32) -> (i32, i32) {
    %c0_i32 = arith.constant 0 : i32
    %c0_i32_0 = arith.constant 0 : i32
    return %arg0, %c0_i32 : i32, i32
  }
  func.func @transform_1(%arg0: i32) -> (i32, i32) {
    %c0_i32 = arith.constant 0 : i32
    %c0_i32_0 = arith.constant 0 : i32
    %c0_i32_1 = arith.constant 0 : i32
    return %c0_i32, %c0_i32_0 : i32, i32
  }
  func.func @transform_2(%arg0: i32) -> (i32, i32) {
    %c0_i32 = arith.constant 0 : i32
    %c0_i32_0 = arith.constant 0 : i32
    %c0_i32_1 = arith.constant 0 : i32
    return %c0_i32, %c0_i32_0 : i32, i32
  }
  func.func @transform_3(%arg0: i32) -> (i32, i32) {
    %c0_i32 = arith.constant 0 : i32
    %c0_i32_0 = arith.constant 0 : i32
    %c0_i32_1 = arith.constant 0 : i32
    return %c0_i32, %c0_i32_0 : i32, i32
  }
  func.func @transform_4(%arg0: i32) -> (i32, i32) {
    %c0_i32 = arith.constant 0 : i32
    %c0_i32_0 = arith.constant 0 : i32
    %c0_i32_1 = arith.constant 0 : i32
    return %c0_i32, %c0_i32_0 : i32, i32
  }
  func.func @transform_5(%arg0: i32) -> (i32, i32) {
    %c0_i32 = arith.constant 0 : i32
    %c0_i32_0 = arith.constant 0 : i32
    return %arg0, %c0_i32 : i32, i32
  }
}

</mosaic_0001>

<bundles_post_ra>
// kernel: tpu_custom_call.1
= control target key start
LH: loop header
LB: loop body
LE: loop exit
PB: predicated region body
PF: predicated region fallthrough
CT: control target
= control target key end

     0   :  { %v30_v28 = vlaneseq  ;;  %v1183_v36 = vmov 1983009808   ;;  %s1442_s0 = inlined_call_operand.vmem [shape: f32[2,1024], index: 0, kind: input, shape index: {}]   ;;  %s1443_s1 = inlined_call_operand.vmem [shape: bf16[1024,8], index: 1, kind: input, shape index: {}]   ;;  %s1444_s2 = inlined_call_operand.vmem [shape: f32[1,8], index: 2, kind: input, shape index: {}]   ;;  %s1445_s3 = inlined_call_operand.vmem [shape: f32[8,128], index: 3, kind: input, shape index: {}]   ;;  %s1446_s4 = inlined_call_operand.vmem [shape: f32[1,128], index: 4, kind: input, shape index: {}]   ;;  %s1447_s5 = inlined_call_operand.hbm [shape: f32[2,128], index: 5, kind: output, shape index: {}]  }
   0x1   :  { %v1077_v0 = vld [vmem:[%s1443_s1 + $0x40] sm:$0xff]   ;;  %v1081_v4 = vld [vmem:[%s1443_s1 + $0x48] sm:$0xff]   ;;  %v1085_v8 = vld [vmem:[%s1443_s1 + $0x50] sm:$0xff]   ;;  %v28_v37 = vunpack.c.l.s4 %v1183_v36 }
   0x2   :  { %v1078_v1 = vld [vmem:[%s1443_s1 + $0xc0] sm:$0xff]   ;;  %978 = vmatprep.subr.bf16.mxu0 %v1077_v0  ;;  %v1082_v5 = vld [vmem:[%s1443_s1 + $0xc8] sm:$0xff]   ;;  %v1086_v9 = vld [vmem:[%s1443_s1 + $0xd0] sm:$0xff]   ;;  %v31_v33 = vshrl.u32 %v30_v28, 7 }
   0x3   :  { %v1079_v2 = vld [vmem:[%s1443_s1] sm:$0xff]   ;;  %1000 = vmatprep.subr.bf16.mxu1 %v1078_v1  ;;  %v1083_v6 = vld [vmem:[%s1443_s1 + $0x8] sm:$0xff]   ;;  %v1087_v10 = vld [vmem:[%s1443_s1 + $0x10] sm:$0xff]   ;;  %v29_v39 = vunpack.c.0.s8 %v28_v37 }
   0x4   :  { %v1080_v3 = vld [vmem:[%s1443_s1 + $0x80] sm:$0xff]   ;;  %979 = vmatpush3.bf16.msra.mxu0 %v1079_v2  ;;  %v1084_v7 = vld [vmem:[%s1443_s1 + $0x88] sm:$0xff]   ;;  %v1088_v11 = vld [vmem:[%s1443_s1 + $0x90] sm:$0xff]  }
   0x5   :  { %1001 = vmatpush3.bf16.msra.mxu1 %v1080_v3  ;;  %980 = vmatprep.subr.bf16.mxu0 %v1081_v4  ;;  %v1089_v12 = vld [vmem:[%s1443_s1 + $0x58] sm:$0xff]   ;;  %v1093_v16 = vld [vmem:[%s1443_s1 + $0x60] sm:$0xff]   ;;  %v1097_v20 = vld [vmem:[%s1443_s1 + $0x68] sm:$0xff]   ;;  %v1322_v41 = vsub.s32 %v29_v39, %v31_v33 }
   0x6   :  { %1002 = vmatprep.subr.bf16.mxu1 %v1082_v5  ;;  %v1090_v13 = vld [vmem:[%s1443_s1 + $0xd8] sm:$0xff]   ;;  %v1094_v17 = vld [vmem:[%s1443_s1 + $0xe0] sm:$0xff]   ;;  %v1098_v21 = vld [vmem:[%s1443_s1 + $0xe8] sm:$0xff]  }
   0x7   :  { %v1091_v14 = vld [vmem:[%s1443_s1 + $0x18] sm:$0xff]   ;;  %v1095_v18 = vld [vmem:[%s1443_s1 + $0x20] sm:$0xff]   ;;  %v1099_v22 = vld [vmem:[%s1443_s1 + $0x28] sm:$0xff]  }
   0x8   :  { %981 = vmatpush3.bf16.msra.mxu0 %v1083_v6  ;;  %v1092_v15 = vld [vmem:[%s1443_s1 + $0x98] sm:$0xff]   ;;  %v1096_v19 = vld [vmem:[%s1443_s1 + $0xa0] sm:$0xff]   ;;  %v1100_v23 = vld [vmem:[%s1443_s1 + $0xa8] sm:$0xff]  }
   0x9   :  { %1003 = vmatpush3.bf16.msra.mxu1 %v1084_v7  ;;  %982 = vmatprep.subr.bf16.mxu0 %v1085_v8  ;;  %v1101_v24 = vld [vmem:[%s1443_s1 + $0x70] sm:$0xff]   ;;  %v1105_v29 = vld [vmem:[%s1443_s1 + $0x78] sm:$0xff]   ;;  %v22_v34 = vld [vmem:[%s1442_s0] sm:$0xff] }
   0xa   :  { %1004 = vmatprep.subr.bf16.mxu1 %v1086_v9  ;;  %v1102_v25 = vld [vmem:[%s1443_s1 + $0xf0] sm:$0xff]   ;;  %v1106_v30 = vld [vmem:[%s1443_s1 + $0xf8] sm:$0xff]   ;;  %v1110_v35 = vld [vmem:[%s1443_s1 + $0x140] sm:$0xff]   ;;  %v26_v40 = vcombine.high %v22_v34, %v22_v34  ;;  %v33_v42 = vrot.slane %v22_v34, %v1322_v41 }
   0xb   :  { %v1103_v26 = vld [vmem:[%s1443_s1 + $0x30] sm:$0xff]   ;;  %v1107_v31 = vld [vmem:[%s1443_s1 + $0x38] sm:$0xff]   ;;  %v1111_v38 = vld [vmem:[%s1443_s1 + $0x1c0] sm:$0xff]  }
   0xc   :  { %983 = vmatpush3.bf16.msra.mxu0 %v1087_v10  ;;  %v1104_v27 = vld [vmem:[%s1443_s1 + $0xb0] sm:$0xff]   ;;  %v1108_v32 = vld [vmem:[%s1443_s1 + $0xb8] sm:$0xff]   ;;  %v40_v43 = vrot.slane %v26_v40, %v1322_v41  ;;  %v41_v44 = vcombine.high %v33_v42, %v33_v42  ;;  %v1112_v46 = vld [vmem:[%s1443_s1 + $0x100] sm:$0xff]   ;;  %v68_v47 = vpack.c.bf16 %v33_v42, %v33_v42 }
   0xd   :  { %1005 = vmatpush3.bf16.msra.mxu1 %v1088_v11  ;;  %984 = vmatprep.subr.bf16.mxu0 %v1089_v12  ;;  %v1113_v49 = vld [vmem:[%s1443_s1 + $0x180] sm:$0xff]   ;;  %v1114_v52 = vld [vmem:[%s1443_s1 + $0x148] sm:$0xff]   ;;  %v1118_v56 = vld [vmem:[%s1443_s1 + $0x150] sm:$0xff]  }
   0xe   :  { %1006 = vmatprep.subr.bf16.mxu1 %v1090_v13  ;;  %v42_v45 = vcombine.high %v40_v43, %v40_v43  ;;  %v70_v48 = vpack.c.bf16 %v40_v43, %v40_v43  ;;  %v69_v50 = vpack.c.bf16 %v41_v44, %v41_v44  ;;  %v1115_v53 = vld [vmem:[%s1443_s1 + $0x1c8] sm:$0xff]   ;;  %v1119_v57 = vld [vmem:[%s1443_s1 + $0x1d0] sm:$0xff]   ;;  %v1122_v60 = vld [vmem:[%s1443_s1 + $0x158] sm:$0xff]  }
   0xf   :  { %v1116_v54 = vld [vmem:[%s1443_s1 + $0x108] sm:$0xff]   ;;  %v1120_v58 = vld [vmem:[%s1443_s1 + $0x110] sm:$0xff]   ;;  %v1123_v61 = vld [vmem:[%s1443_s1 + $0x1d8] sm:$0xff]  }
  0x10   :  { %985 = vmatpush3.bf16.msra.mxu0 %v1091_v14  ;;  %v71_v51 = vpack.c.bf16 %v42_v45, %v42_v45  ;;  %627 = vmatprep.mubr.bf16.mxu0 %v69_v50  ;;  %v1117_v55 = vld [vmem:[%s1443_s1 + $0x188] sm:$0xff]   ;;  %v1121_v59 = vld [vmem:[%s1443_s1 + $0x190] sm:$0xff]   ;;  %v1124_v62 = vld [vmem:[%s1443_s1 + $0x118] sm:$0xff]  }
  0x11   :  { %1007 = vmatpush3.bf16.msra.mxu1 %v1092_v15  ;;  %986 = vmatprep.subr.bf16.mxu0 %v1093_v16  ;;  %v1125_v63 = vld [vmem:[%s1443_s1 + $0x198] sm:$0xff]   ;;  %v1126_v0 = vld [vmem:[%s1443_s1 + $0x160] sm:$0xff]   ;;  %v1130_v4 = vld [vmem:[%s1443_s1 + $0x168] sm:$0xff]  }
  0x12   :  { %1008 = vmatprep.subr.bf16.mxu1 %v1094_v17  ;;  %667 = vmatprep.mubr.bf16.mxu1 %v71_v51  ;;  %v1127_v1 = vld [vmem:[%s1443_s1 + $0x1e0] sm:$0xff]   ;;  %v1131_v5 = vld [vmem:[%s1443_s1 + $0x1e8] sm:$0xff]   ;;  %v1134_v8 = vld [vmem:[%s1443_s1 + $0x170] sm:$0xff]  }
  0x13   :  { %v1128_v2 = vld [vmem:[%s1443_s1 + $0x120] sm:$0xff]   ;;  %v1132_v6 = vld [vmem:[%s1443_s1 + $0x128] sm:$0xff]   ;;  %v1135_v9 = vld [vmem:[%s1443_s1 + $0x1f0] sm:$0xff]  }
  0x14   :  { %987 = vmatpush3.bf16.msra.mxu0 %v1095_v18  ;;  %v1129_v3 = vld [vmem:[%s1443_s1 + $0x1a0] sm:$0xff]   ;;  %v1133_v7 = vld [vmem:[%s1443_s1 + $0x1a8] sm:$0xff]  }
  0x15   :  { %1009 = vmatpush3.bf16.msra.mxu1 %v1096_v19  ;;  %988 = vmatprep.subr.bf16.mxu0 %v1097_v20  ;;  %v23_v10 = vld [vmem:[%s1442_s0 + $0x8] sm:$0xff] }
  0x16   :  { %1010 = vmatprep.subr.bf16.mxu1 %v1098_v21 }
  0x18   :  { %989 = vmatpush3.bf16.msra.mxu0 %v1099_v22 }
  0x19   :  { %1011 = vmatpush3.bf16.msra.mxu1 %v1100_v23  ;;  %990 = vmatprep.subr.bf16.mxu0 %v1101_v24 }
  0x1a   :  { %1012 = vmatprep.subr.bf16.mxu1 %v1102_v25 }
  0x1c   :  { %991 = vmatpush3.bf16.msra.mxu0 %v1103_v26 }
  0x1d   :  { %1013 = vmatpush3.bf16.msra.mxu1 %v1104_v27  ;;  %992 = vmatprep.subr.bf16.mxu0 %v1105_v29 }
  0x1e   :  { %1014 = vmatprep.subr.bf16.mxu1 %v1106_v30 }
  0x20   :  { %993 = vmatpush3.bf16.msra.mxu0 %v1107_v31 }
  0x21   :  { %1015 = vmatpush3.bf16.msra.mxu1 %v1108_v32  ;;  %1022 = vmatprep.subr.bf16.mxu0 %v1110_v35 }
  0x22   :  { %1044 = vmatprep.subr.bf16.mxu1 %v1111_v38 }
  0x23   :  { %628 = vmatmul.mubr.bf16.vlgmr.msra.gmra.mrb[0].mxu0 %v68_v47 }
  0x24   :  { %668 = vmatmul.mubr.bf16.vlgmr.msra.gmra.mrb[0].mxu1 %v70_v48  ;;  %1023 = vmatpush3.bf16.msra.mxu0 %v1112_v46 }
  0x25   :  { %1045 = vmatpush3.bf16.msra.mxu1 %v1113_v49  ;;  %1024 = vmatprep.subr.bf16.mxu0 %v1114_v52 }
  0x26   :  { %1046 = vmatprep.subr.bf16.mxu1 %v1115_v53 }
  0x28   :  { %1025 = vmatpush3.bf16.msra.mxu0 %v1116_v54 }
  0x29   :  { %1047 = vmatpush3.bf16.msra.mxu1 %v1117_v55  ;;  %1026 = vmatprep.subr.bf16.mxu0 %v1118_v56 }
  0x2a   :  { %1048 = vmatprep.subr.bf16.mxu1 %v1119_v57 }
  0x2c   :  { %1027 = vmatpush3.bf16.msra.mxu0 %v1120_v58 }
  0x2d   :  { %1049 = vmatpush3.bf16.msra.mxu1 %v1121_v59  ;;  %1028 = vmatprep.subr.bf16.mxu0 %v1122_v60 }
  0x2e   :  { %1050 = vmatprep.subr.bf16.mxu1 %v1123_v61 }
  0x30   :  { %1029 = vmatpush3.bf16.msra.mxu0 %v1124_v62 }
  0x31   :  { %1051 = vmatpush3.bf16.msra.mxu1 %v1125_v63  ;;  %1030 = vmatprep.subr.bf16.mxu0 %v1126_v0 }
  0x32   :  { %1052 = vmatprep.subr.bf16.mxu1 %v1127_v1 }
  0x34   :  { %1031 = vmatpush3.bf16.msra.mxu0 %v1128_v2 }
  0x35   :  { %1053 = vmatpush3.bf16.msra.mxu1 %v1129_v3  ;;  %1032 = vmatprep.subr.bf16.mxu0 %v1130_v4 }
  0x36   :  { %1054 = vmatprep.subr.bf16.mxu1 %v1131_v5 }
  0x37   :  { %10 = vsyncpa [#allocation3], 0  ;;  %v50_v11 = vrot.slane %v23_v10, %v1322_v41  ;;  %v43_v12 = vcombine.high %v23_v10, %v23_v10  ;;  %v1136_v13 = vld [vmem:[%s1443_s1 + $0x130] sm:$0xff]   ;;  %v1138_v17 = vld [vmem:[%s1443_s1 + $0x178] sm:$0xff]   ;;  %vm758_vm0 = vcmask 58368   ;;  %v1184_v54 = vmov 0.0  }
  0x38   :  { %1033 = vmatpush3.bf16.msra.mxu0 %v1132_v6  ;;  %v1137_v14 = vld [vmem:[%s1443_s1 + $0x1b0] sm:$0xff]   ;;  %v1139_v18 = vld [vmem:[%s1443_s1 + $0x1f8] sm:$0xff]   ;;  %v911_v28 = vld [vmem:[%s1444_s2] ss:$0 sm:$0xff]  ;;  %vm1185_vm1 = vmmov 0   ;;  %vm781_vm4 = vcmask 64512  }
  0x39   :  { %1055 = vmatpush3.bf16.msra.mxu1 %v1133_v7  ;;  %v58_v15 = vcombine.high %v50_v11, %v50_v11  ;;  %v57_v16 = vrot.slane %v43_v12, %v1322_v41  ;;  %1034 = vmatprep.subr.bf16.mxu0 %v1134_v8  ;;  %v1140_v21 = vld [vmem:[%s1443_s1 + $0x138] sm:$0xff]   ;;  %v72_v24 = vpack.c.bf16 %v50_v11, %v50_v11  ;;  %v755_v53 = vld [vmem:[%s1445_s3] sm:$0xff] }
  0x3a   :  { %1056 = vmatprep.subr.bf16.mxu1 %v1135_v9  ;;  %v1141_v22 = vld [vmem:[%s1443_s1 + $0x1b8] sm:$0xff]   ;;  %v977_v11 = vld [vmem:[%s1446_s4] ss:$0 sm:$0xff]  ;;  %s1186_s4 = smov [#allocation2]  }
  0x3b   :  { %v73_v19 = vpack.c.bf16 %v58_v15, %v58_v15  ;;  %v59_v20 = vcombine.high %v57_v16, %v57_v16  ;;  %v74_v25 = vpack.c.bf16 %v57_v16, %v57_v16  ;;  %s903_s27 = sshll.u32 %s1186_s4, 4  ;;  %s904_s27 = int_to_ptr.vmem [resolvable:$true] %s903_s27 }
  0x3c   :  { %1035 = vmatpush3.bf16.msra.mxu0 %v1136_v13  ;;  %s1159_s28 = scalar_lea.vmem %s904_s27, 32  ;;  %p1164_p1 = scmp.lt.s32.totalorder %s904_s27, %s904_s27 }
  0x3d   :  { %1057 = vmatpush3.bf16.msra.mxu1 %v1137_v14  ;;  %v75_v23 = vpack.c.bf16 %v59_v20, %v59_v20  ;;  %1036 = vmatprep.subr.bf16.mxu0 %v1138_v17  ;;  %p1160_p0 = scmp.ne.s32.totalorder %s904_s27, %s1159_s28  ;;  %p1165_p2 = scmp.lt.s32.totalorder %s1159_s28, %s1159_s28 }
  0x3e   :  { %1058 = vmatprep.subr.bf16.mxu1 %v1139_v18  ;;  %707 = vmatprep.mubr.bf16.mxu0 %v73_v19 }
  0x3f   :  { %747 = vmatprep.mubr.bf16.mxu1 %v75_v23  ;;  %p1166_p3 = por %p1165_p2, %p1164_p1 }
  0x40   :  { %1037 = vmatpush3.bf16.msra.mxu0 %v1140_v21 }
  0x41   :  { %1059 = vmatpush3.bf16.msra.mxu1 %v1141_v22  ;;  %1068 = vmatprep.subr.mxu0 %v1184_v54  ;;  %p1167_p4 = pnand %p1166_p3, %p1160_p0 }
  0x43   :  { %708 = vmatmul.mubr.bf16.vlgmr.msra.gmra.mrb[4].mxu0 %v72_v24 }
  0x44   :  { %748 = vmatmul.mubr.bf16.vlgmr.msra.gmra.mrb[4].mxu1 %v74_v25  ;;  %1070 = vmatprep.mubr.msk.f32.mxu0 %vm1185_vm1, %v1184_v54 }
  0x45   :  { %1069 = vmatpush3.msra.mxu0 %v755_v53 }
  0xf6   :  { %v994_v26 = vpop.f32.mrb[0].mxu0 }
  0xf7   :  { %v1016_v27 = vpop.f32.mrb[0].mxu1  ;;  %v995_v29 = vpop.f32.mrb[1].mxu0 }
  0xf8   :  { %v1017_v30 = vpop.f32.mrb[1].mxu1  ;;  %v996_v31 = vadd.f32 %v995_v29, %v994_v26  ;;  %v997_v33 = vpop.f32.mrb[2].mxu0 }
  0xf9   :  { %v1018_v32 = vadd.f32 %v1017_v30, %v1016_v27  ;;  %v1019_v34 = vpop.f32.mrb[2].mxu1  ;;  %v998_v35 = vpop.f32.mrb[3].mxu0 }
  0xfa   :  { %v1020_v36 = vpop.f32.mrb[3].mxu1  ;;  %v630_v37 = vadd.f32 %v996_v31, %v911_v28 }
  0xfc   :  { %v670_v38 = vadd.f32 %v1018_v32, %v630_v37 }
 0x116   :  { %v1038_v39 = vpop.f32.mrb[4].mxu0 }
 0x117   :  { %v1060_v40 = vpop.f32.mrb[4].mxu1  ;;  %v1039_v41 = vpop.f32.mrb[5].mxu0 }
 0x118   :  { %v1061_v42 = vpop.f32.mrb[5].mxu1  ;;  %v1040_v43 = vadd.f32 %v1039_v41, %v1038_v39  ;;  %v1041_v45 = vpop.f32.mrb[6].mxu0 }
 0x119   :  { %v1062_v44 = vadd.f32 %v1061_v42, %v1060_v40  ;;  %v1063_v46 = vpop.f32.mrb[6].mxu1  ;;  %v1042_v47 = vpop.f32.mrb[7].mxu0 }
 0x11a   :  { %v1064_v48 = vpop.f32.mrb[7].mxu1  ;;  %v710_v49 = vadd.f32 %v1040_v43, %v670_v38 }
 0x11c   :  { %v750_v50 = vadd.f32 %v1062_v44, %v710_v49 }
 0x11e   :  { %v757_v51 = vmul.f32 %v750_v50, %v750_v50 }
 0x120   :  { %v759_v52 = vsel %vm758_vm0, %v757_v51, 0.0 }
 0x121   :  { %760 = vadd.xlane.f32.xlu0 %v759_v52 }
 0x1ae   :  { %v761_v55 = vpop.xlane.xlu0 %760 }
 0x1af   :  { %1143 = vrsqrt.f32 %v761_v55  ;;  %vm764_vm2 = vcmp.eq.f32.partialorder %v761_v55, inf  ;;  %v767_v58 = vand.u32 2147483648, %v761_v55  ;;  %vm766_vm3 = vcmp.eq.f32.partialorder %v761_v55, 0.0 }
 0x1b9   :  { %v1144_v56 = vpop.eup %1143 }
 0x1ba   :  { %v763_v57 = vmul.f32 %v1144_v56, %v761_v55 }
 0x1bc   :  { %v765_v59 = vsel %vm764_vm2, %v761_v55, %v763_v57 }
 0x1bd   :  { %v768_v60 = vsel %vm766_vm3, %v767_v58, %v765_v59 }
 0x1be   :  { %v769_v61 = vmax.f32 %v768_v60, 1e-15  ;;  %v773_v62 = vmin.f32 %v768_v60, 1.0 }
 0x1c0   :  { %1145 = vrcp.f32 %v769_v61  ;;  %v774_v63 = vmax.f32 %v773_v62, 1e-15 }
 0x1c2   :  { %1147 = vtanh.f32 %v774_v63 }
 0x1c3   :  { %1149 = vrcp.f32 %v774_v63 }
 0x1ca   :  { %v1146_v0 = vpop.eup %1145 }
 0x1cb   :  { %v772_v1 = vmin.f32 %v1146_v0, 1.0 }
 0x1cc   :  { %v1148_v2 = vpop.eup %1147 }
 0x1cd   :  { %v776_v3 = vmul.f32 %v1148_v2, %v772_v1  ;;  %v1150_v4 = vpop.eup %1149  ;;  %v780_v8 = vmul.f32 %v1148_v2, %v1148_v2 }
 0x1cf   :  { %v778_v5 = vmul.f32 %v1150_v4, %v776_v3  ;;  %v875_v14 = vmul.f32 %v977_v11, %v780_v8  ;;  %v865_v16 = vsub.f32 1.0, %v780_v8 }
 0x1d1   :  { %v779_v6 = vmul.f32 %v778_v5, %v750_v50  ;;  %v872_v22 = vmul.f32 %v865_v16, %v865_v16 }
 0x1d3   :  { %1071 = vmatmul.mubr.msk.f32.vlgmr.msra.gmra.mrb[8].mxu0 %vm781_vm4, %v779_v6  ;;  %v873_v25 = vmul.f32 %v977_v11, %v872_v22 }
 0x2a6   :  { %v851_v7 = vpop.f32.mrb[8].mxu0 }
 0x2a7   :  { %v855_v9 = vsub.f32 0.0, %v851_v7  ;;  %v1072_v10 = vpop.f32.mrb[9].mxu0 }
 0x2a9   :  { %v856_v12 = vmul.f32 2.0, %v855_v9 }
 0x2ab   :  { %v857_v13 = vadd.f32 1.0, %v856_v12 }
 0x2ad   :  { %v864_v15 = vadd.f32 %v977_v11, %v857_v13  ;;  %v876_v17 = vadd.f32 %v875_v14, %v857_v13 }
 0x2af   :  { %v866_v18 = vmul.f32 %v864_v15, %v864_v15  ;;  %v868_v19 = vmul.f32 2.0, %v864_v15 }
 0x2b1   :  { %v867_v20 = vmul.f32 %v866_v18, %v780_v8  ;;  %v869_v21 = vmul.f32 %v868_v19, %v865_v16 }
 0x2b3   :  { %v870_v23 = vmul.f32 %v869_v21, %v855_v9 }
 0x2b5   :  { %v871_v24 = vadd.f32 %v870_v23, %v867_v20 }
 0x2b7   :  { %v874_v26 = vadd.f32 %v873_v25, %v871_v24 }
 0x2b9   :  { %v877_v27 = vmax.f32 %v874_v26, 0.0 }
 0x2bb   :  { %1151 = vrsqrt.f32 %v877_v27  ;;  %vm880_vm5 = vcmp.eq.f32.partialorder %v877_v27, inf  ;;  %v883_v30 = vand.u32 2147483648, %v877_v27  ;;  %vm882_vm6 = vcmp.eq.f32.partialorder %v877_v27, 0.0 }
 0x2bc   :  { %1153 = vrcp.f32 %v876_v17 }
 0x2c5   :  { %v1152_v28 = vpop.eup %1151 }
 0x2c6   :  { %v879_v29 = vmul.f32 %v1152_v28, %v877_v27  ;;  %v1154_v32 = vpop.eup %1153 }
 0x2c8   :  { %v881_v31 = vsel %vm880_vm5, %v877_v27, %v879_v29 }
 0x2c9   :  { %v884_v33 = vsel %vm882_vm6, %v883_v30, %v881_v31 }
 0x2ca   :  { %v886_v34 = vmul.f32 %v1154_v32, %v884_v33 }
 0x2cc   :  { %v887_v35 = vmax.f32 %v886_v34, 0.0 }
 0x2ce   :  { %v888_v36 = vmin.f32 %v887_v35, 0.9999999 }
 0x2d0   :  { %v890_v37 = vsub.f32 1.0, %v888_v36  ;;  %v889_v38 = vadd.f32 1.0, %v888_v36 }
 0x2d2   :  { %1155 = vrcp.f32 %v890_v37 }
 0x2dc   :  { %v1156_v39 = vpop.eup %1155 }
 0x2dd   :  { %v892_v40 = vmul.f32 %v1156_v39, %v889_v38 }
 0x2df   :  { %1157 = vlog2.f32 %v892_v40 }
 0x2e9   :  { %v1158_v41 = vpop.eup %1157 }
 0x2ea   :  { %v894_v42 = vmul.f32 0.6931472, %v1158_v41 }
 0x2ec   :  { %v895_v43 = vmul.f32 -100.0, %v894_v42 }
 0x2ee   :  { %896 = vst [vmem:[#allocation2] sm:$0x3] %v895_v43 }
 0x2ef   :  { %1170 = shalt.err (!%p1167_p4)
}
 0x2f0   :  { %s1171_s6 = scalar_lea.hbm %s1447_s5, 32 }
 0x2f1   :  { %p1172_p5 = scmp.ne.s32.totalorder %s1447_s5, %s1171_s6  ;;  %p1175_p6 = scmp.lt.u32.totalorder %s1171_s6, %s1447_s5 }
 0x2f3   :  { %p1177_p7 = pnand %p1175_p6, %p1172_p5 }
 0x2f5   :  { %1180 = shalt.err (!%p1177_p7)
}
 0x2f6   :  { %906 = dma.vmem_to_hbm [thread:$0]  %s904_s27, 32, %s1447_s5, [#allocation3]  }
 0x2f7   :  { %1181 = dma.done.wait [#allocation3], 32  }
 0x2f8   :  { %1182 = vsyncadd [#allocation3], 4294967264 }
 0x2f9   :  { %910 = vsyncpa [#allocation3], 1 }

</bundles_post_ra>
